<compile_context>
chip_gen: v5e
topology: v5e:2x2
jax: 0.10.0
libtpu: 0.0.40
codegen_flags: <defaults>
</compile_context>

<pallas_src>
import functools

import jax
import jax.numpy as jnp
from jax.experimental import pallas as pl
from jax.experimental.pallas import tpu as pltpu


def _round_up(x, m):
    return -(-x // m) * m


def _pick_block_b(B, Lq, *, target_rows=2048, min_grid=4):
    """Pick a batch block size.

    Targets ~1024-4096 MXU rows (block_b * Lq) per grid step, keeps at least
    `min_grid` blocks on large B (so v7x's 2 TensorCores both get work), and
    prefers an 8-aligned divisor of B so the wrapper never has to pad/slice.
    """
    desired = max(1, target_rows // max(Lq, 1))
    if desired >= B:
        return B                              # single full-batch block
    if B // min_grid >= 8:
        desired = min(desired, B // min_grid)  # keep >= min_grid grid steps
    desired = min(desired, B)
    # Largest 8-aligned divisor of B that is <= desired (no batch padding).
    for bb in range(desired, 7, -1):
        if B % bb == 0 and bb % 8 == 0:
            return bb
    # No aligned divisor: take an aligned block; wrapper pads the batch.
    return max(8, (desired // 8) * 8)


def cross_attention_kernel(q_ref, k_ref, v_ref,
                           wq_ref, bq_ref,
                           wk_ref, bk_ref,
                           wv_ref, bv_ref,
                           o_ref, *, block_b, lq, lk, lane_dense):
    dout = wq_ref.shape[1]
    mxu_dtype = wq_ref.dtype            # weights pre-cast once in the wrapper

    def project(x_ref, w_ref, b_ref):
        # One flat (TB*L, D) @ (D, Dout) MXU matmul + fused f32 bias add.
        x = x_ref[...].astype(mxu_dtype)
        y = jnp.dot(x, w_ref[...], preferred_element_type=jnp.float32)
        return y + b_ref[...]

    q_emb = project(q_ref, wq_ref, bq_ref).reshape(block_b, lq, dout)
    k_emb = project(k_ref, wk_ref, bk_ref).reshape(block_b, lk, dout)
    v_emb = project(v_ref, wv_ref, bv_ref).reshape(block_b, lk, dout)

    # Attention scores: contract the embedding dim directly (no explicit .T).
    scores = jax.lax.dot_general(
        q_emb.astype(mxu_dtype), k_emb.astype(mxu_dtype),
        dimension_numbers=(((2,), (2,)), ((0,), (0,))),
        preferred_element_type=jnp.float32)          # (TB, Lq, Lk)

    # Numerically stable softmax; all elementwise math in f32.
    m = jnp.max(scores, axis=-1, keepdims=True)
    e = jnp.exp(scores - m)
    denom = jnp.sum(e, axis=-1, keepdims=True)
    probs = e * pl.reciprocal(denom, approx=True)    # EUP slot, frees VALU

    # Attended values: (TB, Lq, Lk) @ (TB, Lk, Dout) -> (TB, Lq, Dout)
    out = jax.lax.dot_general(
        probs.astype(mxu_dtype), v_emb.astype(mxu_dtype),
        dimension_numbers=(((2,), (1,)), ((0,), (0,))),
        preferred_element_type=jnp.float32)

    if lane_dense:
        # Lane-dense store: collapse (Lq, Dout) into Lq*Dout lanes (>=128,
        # multiple of 128) so the writeback is unmasked full-lane vst.
        o_ref[...] = out.reshape(block_b, lq * dout).astype(o_ref.dtype)
    else:
        o_ref[...] = out.astype(o_ref.dtype)


def cross_attention(query, key, value, params, *, block_b=None,
                    use_bf16_mxu=True, target_rows=2048, min_grid=4):
    """query: (B, Lq, Qd), key: (B, Lk, Kd), value: (B, Lk, Vd) -> (B, Lq, Qd)."""
    B, Lq, Qd_in = query.shape
    _, Lk, Kd = key.shape
    _, _, Vd = value.shape

    wq, bq, wk, bk, wv, bv = params      # wq:(Qd,Qd) wk:(Kd,Qd) wv:(Vd,Qd)
    Dout = wq.shape[1]                   # projection output dim (= query_dim)

    # Resident weights: cast to the MXU operand dtype ONCE here (not per grid
    # step in the kernel); biases stay f32 (added to the f32 accumulator).
    mxu_dtype = jnp.bfloat16 if use_bf16_mxu else jnp.float32
    wq = jnp.asarray(wq).astype(mxu_dtype)
    wk = jnp.asarray(wk).astype(mxu_dtype)
    wv = jnp.asarray(wv).astype(mxu_dtype)
    bq = jnp.asarray(bq, jnp.float32).reshape(1, Dout)
    bk = jnp.asarray(bk, jnp.float32).reshape(1, Dout)
    bv = jnp.asarray(bv, jnp.float32).reshape(1, Dout)

    # --- batch blocking --------------------------------------------------
    if block_b is None:
        block_b = _pick_block_b(B, Lq, target_rows=target_rows,
                                min_grid=min_grid)
    block_b = int(block_b)
    if block_b >= B:
        block_b = B                       # full batch: no alignment needed
    elif block_b % 8 != 0:
        block_b = min(B, _round_up(block_b, 8))   # keep blocks sublane-aligned

    if B % block_b != 0:
        # Last-resort fallback (no aligned divisor of B): pad the batch.
        Bp = _round_up(B, block_b)
        pad_b = ((0, Bp - B), (0, 0), (0, 0))
        query = jnp.pad(query, pad_b)
        key = jnp.pad(key, pad_b)
        value = jnp.pad(value, pad_b)
    else:
        Bp = B

    grid = (Bp // block_b,)

    # Inputs pre-flattened to 2-D (B*L, D): free metadata reshape in XLA and
    # no in-kernel ref reshape that could materialize a VMEM copy.
    q2 = query.reshape(Bp * Lq, Qd_in)
    k2 = key.reshape(Bp * Lk, Kd)
    v2 = value.reshape(Bp * Lk, Vd)

    # Lane-dense output path: (Bp, Lq*Dout) when the collapsed last dim is a
    # multiple of 128; otherwise plain (Bp, Lq, Dout) (correct, just masked).
    lane_dense = (Lq * Dout) % 128 == 0
    if lane_dense:
        out_shape = jax.ShapeDtypeStruct((Bp, Lq * Dout), query.dtype)
        out_spec = pl.BlockSpec((block_b, Lq * Dout), lambda b: (b, 0))
    else:
        out_shape = jax.ShapeDtypeStruct((Bp, Lq, Dout), query.dtype)
        out_spec = pl.BlockSpec((block_b, Lq, Dout), lambda b: (b, 0, 0))

    def stream2d(rows, cols):
        return pl.BlockSpec((rows, cols), lambda b: (b, 0))

    def resident(shape):
        return pl.BlockSpec(shape, lambda b: tuple(0 for _ in shape))

    kernel = functools.partial(cross_attention_kernel,
                               block_b=block_b, lq=Lq, lk=Lk,
                               lane_dense=lane_dense)

    out = pl.pallas_call(
        kernel,
        out_shape=out_shape,
        grid_spec=pltpu.PrefetchScalarGridSpec(
            num_scalar_prefetch=0,
            grid=grid,
            in_specs=[
                stream2d(block_b * Lq, Qd_in),   # query block  (flat rows)
                stream2d(block_b * Lk, Kd),      # key block
                stream2d(block_b * Lk, Vd),      # value block
                resident(wq.shape), resident(bq.shape),
                resident(wk.shape), resident(bk.shape),
                resident(wv.shape), resident(bv.shape),
            ],
            out_specs=out_spec,
        ),
        compiler_params=pltpu.CompilerParams(
            # Batch blocks shard across TensorCores on v7x megacore.
            dimension_semantics=("parallel",),
            # Raise the scoped-VMEM limit above v5e's 16 MiB default so large
            # batch blocks compile; stays well under v7x's 64 MiB physical.
            vmem_limit_bytes=48 * 1024 * 1024,
        ),
    )(q2, k2, v2, wq, bq, wk, bk, wv, bv)

    if lane_dense:
        out = out.reshape(Bp, Lq, Dout)
    if Bp != B:
        out = out[:B]
    return out


def init_params(key, query_dim, key_dim, value_dim):
    """Deterministic init mimicking nn.Linear defaults (uniform +/- 1/sqrt(fan_in)).
    Weights are stored pre-transposed as (in_features, out_features)."""
    ks = jax.random.split(key, 6)

    def linear(kw, kb, fan_in, fan_out):
        bound = 1.0 / jnp.sqrt(float(fan_in))
        w = jax.random.uniform(kw, (fan_in, fan_out), jnp.float32, -bound, bound)
        b = jax.random.uniform(kb, (1, fan_out), jnp.float32, -bound, bound)
        return w, b

    wq, bq = linear(ks[0], ks[1], query_dim, query_dim)
    wk, bk = linear(ks[2], ks[3], key_dim, query_dim)
    wv, bv = linear(ks[4], ks[5], value_dim, query_dim)
    return wq, bq, wk, bk, wv, bv


def cross_attention_ref(query, key, value, params):
    """Pure-JAX reference matching the PyTorch forward."""
    wq, bq, wk, bk, wv, bv = params
    q_emb = query @ wq + bq
    k_emb = key @ wk + bk
    v_emb = value @ wv + bv
    scores = jnp.einsum("bqd,bkd->bqk", q_emb, k_emb)
    probs = jax.nn.softmax(scores, axis=-1)
    return jnp.einsum("bqk,bkd->bqd", probs, v_emb)


if __name__ == "__main__":
    B, Lq, Lk = 2, 8, 8
    query_dim, key_dim, value_dim = 32, 16, 24

    root = jax.random.PRNGKey(0)
    kq, kk, kv, kp = jax.random.split(root, 4)
    query = jax.random.normal(kq, (B, Lq, query_dim), jnp.float32)
    key = jax.random.normal(kk, (B, Lk, key_dim), jnp.float32)
    value = jax.random.normal(kv, (B, Lk, value_dim), jnp.float32)

    params = init_params(kp, query_dim, key_dim, value_dim)
    ref = cross_attention_ref(query, key, value, params)

    # f32 MXU operands.
    out_f32 = jax.block_until_ready(
        cross_attention(query, key, value, params, use_bf16_mxu=False))
    assert out_f32.shape == (B, Lq, query_dim)
    assert jnp.allclose(out_f32, ref, atol=1e-2, rtol=1e-2), "f32 path mismatch"

    # bf16 MXU operands, f32 accumulation (default; valid on v5e/v6e/v7x).
    out_bf16 = jax.block_until_ready(
        cross_attention(query, key, value, params, use_bf16_mxu=True))
    assert jnp.allclose(out_bf16, ref, atol=5e-2, rtol=5e-2), "bf16 path mismatch"

    # Multi-block grid path (explicit block_b, 2 grid steps).
    B2 = 16
    kq2, kk2, kv2 = jax.random.split(jax.random.PRNGKey(1), 3)
    q_big = jax.random.normal(kq2, (B2, Lq, query_dim), jnp.float32)
    k_big = jax.random.normal(kk2, (B2, Lk, key_dim), jnp.float32)
    v_big = jax.random.normal(kv2, (B2, Lk, value_dim), jnp.float32)
    ref_big = cross_attention_ref(q_big, k_big, v_big, params)
    out_big = jax.block_until_ready(
        cross_attention(q_big, k_big, v_big, params, block_b=8,
                        use_bf16_mxu=False))
    assert jnp.allclose(out_big, ref_big, atol=1e-2, rtol=1e-2), \
        "multi-block path mismatch"

    print("KERNEL_OK")
</pallas_src>

<mosaic_0001>
module attributes {stable_mosaic.version = 11 : i64} {
  func.func @cross_attention_kernel(%arg0: i32, %arg1: memref<16x32xf32, #tpu.memory_space<vmem>>, %arg2: memref<16x16xf32, #tpu.memory_space<vmem>>, %arg3: memref<16x24xf32, #tpu.memory_space<vmem>>, %arg4: memref<32x32xf32, #tpu.memory_space<vmem>>, %arg5: memref<1x32xf32, #tpu.memory_space<vmem>>, %arg6: memref<16x32xf32, #tpu.memory_space<vmem>>, %arg7: memref<1x32xf32, #tpu.memory_space<vmem>>, %arg8: memref<24x32xf32, #tpu.memory_space<vmem>>, %arg9: memref<1x32xf32, #tpu.memory_space<vmem>>, %arg10: memref<2x256xf32, #tpu.memory_space<vmem>>) attributes {dimension_semantics = [#tpu.dimension_semantics<parallel>], iteration_bounds = array<i64: 1>, scalar_prefetch = 0 : i64, scratch_operands = 0 : i64, tpu.core_type = #tpu.core_type<tc>, window_params = [{transform_indices = @transform_0, window_bounds = array<i64: 16, 32>}, {transform_indices = @transform_1, window_bounds = array<i64: 16, 16>}, {transform_indices = @transform_2, window_bounds = array<i64: 16, 24>}, {pipeline_mode = #tpu.pipeline_mode<synchronous>, transform_indices = @transform_3, window_bounds = array<i64: 32, 32>}, {pipeline_mode = #tpu.pipeline_mode<synchronous>, transform_indices = @transform_4, window_bounds = array<i64: 1, 32>}, {pipeline_mode = #tpu.pipeline_mode<synchronous>, transform_indices = @transform_5, window_bounds = array<i64: 16, 32>}, {pipeline_mode = #tpu.pipeline_mode<synchronous>, transform_indices = @transform_6, window_bounds = array<i64: 1, 32>}, {pipeline_mode = #tpu.pipeline_mode<synchronous>, transform_indices = @transform_7, window_bounds = array<i64: 24, 32>}, {pipeline_mode = #tpu.pipeline_mode<synchronous>, transform_indices = @transform_8, window_bounds = array<i64: 1, 32>}, {transform_indices = @transform_9, window_bounds = array<i64: 2, 256>}]} {
    %c0 = arith.constant 0 : index
    %c0_0 = arith.constant 0 : index
    %0 = vector.load %arg1[%c0, %c0_0] : memref<16x32xf32, #tpu.memory_space<vmem>>, vector<16x32xf32>
    %c0_1 = arith.constant 0 : index
    %c0_2 = arith.constant 0 : index
    %1 = vector.load %arg4[%c0_1, %c0_2] : memref<32x32xf32, #tpu.memory_space<vmem>>, vector<32x32xf32>
    %cst = arith.constant dense<0.000000e+00> : vector<16x32xf32>
    %2 = tpu.matmul %0, %1, %cst {dimension_numbers = #tpu.dot_dimension_numbers<[1], [0], [0], [1], [0, 0, 1, 1], [], []>} : vector<16x32xf32>, vector<32x32xf32>, vector<16x32xf32> -> vector<16x32xf32>
    %c0_3 = arith.constant 0 : index
    %c0_4 = arith.constant 0 : index
    %3 = vector.load %arg5[%c0_3, %c0_4] : memref<1x32xf32, #tpu.memory_space<vmem>>, vector<1x32xf32>
    %4 = vector.broadcast %3 : vector<1x32xf32> to vector<16x32xf32>
    %5 = arith.addf %2, %4 : vector<16x32xf32>
    %6 = vector.shape_cast %5 : vector<16x32xf32> to vector<2x8x32xf32>
    %c0_5 = arith.constant 0 : index
    %c0_6 = arith.constant 0 : index
    %7 = vector.load %arg2[%c0_5, %c0_6] : memref<16x16xf32, #tpu.memory_space<vmem>>, vector<16x16xf32>
    %c0_7 = arith.constant 0 : index
    %c0_8 = arith.constant 0 : index
    %8 = vector.load %arg6[%c0_7, %c0_8] : memref<16x32xf32, #tpu.memory_space<vmem>>, vector<16x32xf32>
    %cst_9 = arith.constant dense<0.000000e+00> : vector<16x32xf32>
    %9 = tpu.matmul %7, %8, %cst_9 {dimension_numbers = #tpu.dot_dimension_numbers<[1], [0], [0], [1], [0, 0, 1, 1], [], []>} : vector<16x16xf32>, vector<16x32xf32>, vector<16x32xf32> -> vector<16x32xf32>
    %c0_10 = arith.constant 0 : index
    %c0_11 = arith.constant 0 : index
    %10 = vector.load %arg7[%c0_10, %c0_11] : memref<1x32xf32, #tpu.memory_space<vmem>>, vector<1x32xf32>
    %11 = vector.broadcast %10 : vector<1x32xf32> to vector<16x32xf32>
    %12 = arith.addf %9, %11 : vector<16x32xf32>
    %13 = vector.shape_cast %12 : vector<16x32xf32> to vector<2x8x32xf32>
    %c0_12 = arith.constant 0 : index
    %c0_13 = arith.constant 0 : index
    %14 = vector.load %arg3[%c0_12, %c0_13] : memref<16x24xf32, #tpu.memory_space<vmem>>, vector<16x24xf32>
    %c0_14 = arith.constant 0 : index
    %c0_15 = arith.constant 0 : index
    %15 = vector.load %arg8[%c0_14, %c0_15] : memref<24x32xf32, #tpu.memory_space<vmem>>, vector<24x32xf32>
    %cst_16 = arith.constant dense<0.000000e+00> : vector<16x32xf32>
    %16 = tpu.matmul %14, %15, %cst_16 {dimension_numbers = #tpu.dot_dimension_numbers<[1], [0], [0], [1], [0, 0, 1, 1], [], []>} : vector<16x24xf32>, vector<24x32xf32>, vector<16x32xf32> -> vector<16x32xf32>
    %c0_17 = arith.constant 0 : index
    %c0_18 = arith.constant 0 : index
    %17 = vector.load %arg9[%c0_17, %c0_18] : memref<1x32xf32, #tpu.memory_space<vmem>>, vector<1x32xf32>
    %18 = vector.broadcast %17 : vector<1x32xf32> to vector<16x32xf32>
    %19 = arith.addf %16, %18 : vector<16x32xf32>
    %20 = vector.shape_cast %19 : vector<16x32xf32> to vector<2x8x32xf32>
    %cst_19 = arith.constant dense<0.000000e+00> : vector<2x8x8xf32>
    %21 = tpu.matmul %6, %13, %cst_19 {dimension_numbers = #tpu.dot_dimension_numbers<[2], [2], [1], [1], [0, 0, 0, 1, 1, 1], [0], [0]>} : vector<2x8x32xf32>, vector<2x8x32xf32>, vector<2x8x8xf32> -> vector<2x8x8xf32>
    %cst_20 = arith.constant dense<0xFF800000> : vector<2x8xf32>
    %22 = vector.multi_reduction <maximumf>, %21, %cst_20 [2] : vector<2x8x8xf32> to vector<2x8xf32>
    %23 = vector.shape_cast %22 : vector<2x8xf32> to vector<2x8x1xf32>
    %24 = vector.broadcast %23 : vector<2x8x1xf32> to vector<2x8x8xf32>
    %25 = arith.subf %21, %24 : vector<2x8x8xf32>
    %26 = math.exp %25 : vector<2x8x8xf32>
    %cst_21 = arith.constant dense<0.000000e+00> : vector<2x8xf32>
    %27 = vector.multi_reduction <add>, %26, %cst_21 [2] : vector<2x8x8xf32> to vector<2x8xf32>
    %28 = vector.shape_cast %27 : vector<2x8xf32> to vector<2x8x1xf32>
    %29 = tpu.reciprocal %28 {approx = true} : vector<2x8x1xf32> -> vector<2x8x1xf32>
    %30 = vector.broadcast %29 : vector<2x8x1xf32> to vector<2x8x8xf32>
    %31 = arith.mulf %26, %30 : vector<2x8x8xf32>
    %cst_22 = arith.constant dense<0.000000e+00> : vector<2x8x32xf32>
    %32 = tpu.matmul %31, %20, %cst_22 {dimension_numbers = #tpu.dot_dimension_numbers<[2], [1], [1], [2], [0, 0, 0, 1, 1, 2], [0], [0]>} : vector<2x8x8xf32>, vector<2x8x32xf32>, vector<2x8x32xf32> -> vector<2x8x32xf32>
    %33 = vector.shape_cast %32 : vector<2x8x32xf32> to vector<2x256xf32>
    %c0_23 = arith.constant 0 : index
    %c0_24 = arith.constant 0 : index
    %34 = vector.load %arg10[%c0_23, %c0_24] : memref<2x256xf32, #tpu.memory_space<vmem>>, vector<2x256xf32>
    tpu.vector_store %arg10[%c0_23, %c0_24], %33 {strides = array<i32>} : memref<2x256xf32, #tpu.memory_space<vmem>>, vector<2x256xf32>,
    return
  }
  func.func @transform_0(%arg0: i32) -> (i32, i32) {
    %c0_i32 = arith.constant 0 : i32
    %c0_i32_0 = arith.constant 0 : i32
    return %arg0, %c0_i32 : i32, i32
  }
  func.func @transform_1(%arg0: i32) -> (i32, i32) {
    %c0_i32 = arith.constant 0 : i32
    %c0_i32_0 = arith.constant 0 : i32
    return %arg0, %c0_i32 : i32, i32
  }
  func.func @transform_2(%arg0: i32) -> (i32, i32) {
    %c0_i32 = arith.constant 0 : i32
    %c0_i32_0 = arith.constant 0 : i32
    return %arg0, %c0_i32 : i32, i32
  }
  func.func @transform_3(%arg0: i32) -> (i32, i32) {
    %c0_i32 = arith.constant 0 : i32
    %c0_i32_0 = arith.constant 0 : i32
    %c0_i32_1 = arith.constant 0 : i32
    return %c0_i32, %c0_i32_0 : i32, i32
  }
  func.func @transform_4(%arg0: i32) -> (i32, i32) {
    %c0_i32 = arith.constant 0 : i32
    %c0_i32_0 = arith.constant 0 : i32
    %c0_i32_1 = arith.constant 0 : i32
    return %c0_i32, %c0_i32_0 : i32, i32
  }
  func.func @transform_5(%arg0: i32) -> (i32, i32) {
    %c0_i32 = arith.constant 0 : i32
    %c0_i32_0 = arith.constant 0 : i32
    %c0_i32_1 = arith.constant 0 : i32
    return %c0_i32, %c0_i32_0 : i32, i32
  }
  func.func @transform_6(%arg0: i32) -> (i32, i32) {
    %c0_i32 = arith.constant 0 : i32
    %c0_i32_0 = arith.constant 0 : i32
    %c0_i32_1 = arith.constant 0 : i32
    return %c0_i32, %c0_i32_0 : i32, i32
  }
  func.func @transform_7(%arg0: i32) -> (i32, i32) {
    %c0_i32 = arith.constant 0 : i32
    %c0_i32_0 = arith.constant 0 : i32
    %c0_i32_1 = arith.constant 0 : i32
    return %c0_i32, %c0_i32_0 : i32, i32
  }
  func.func @transform_8(%arg0: i32) -> (i32, i32) {
    %c0_i32 = arith.constant 0 : i32
    %c0_i32_0 = arith.constant 0 : i32
    %c0_i32_1 = arith.constant 0 : i32
    return %c0_i32, %c0_i32_0 : i32, i32
  }
  func.func @transform_9(%arg0: i32) -> (i32, i32) {
    %c0_i32 = arith.constant 0 : i32
    %c0_i32_0 = arith.constant 0 : i32
    return %arg0, %c0_i32 : i32, i32
  }
}

</mosaic_0001>

<bundles_post_ra>
// kernel: tpu_custom_call.1
= control target key start
LH: loop header
LB: loop body
LE: loop exit
PB: predicated region body
PF: predicated region fallthrough
CT: control target
= control target key end

     0   :  { %14 = vsyncpa [#allocation3], 0  ;;  %s828_s0 = inlined_call_operand.hbm [shape: f32[16,32], index: 0, kind: input, shape index: {}]   ;;  %s829_s1 = inlined_call_operand.hbm [shape: f32[16,16], index: 1, kind: input, shape index: {}]   ;;  %s830_s2 = inlined_call_operand.hbm [shape: f32[16,24], index: 2, kind: input, shape index: {}]   ;;  %s831_s3 = inlined_call_operand.hbm [shape: f32[32,32], index: 3, kind: input, shape index: {}]   ;;  %s832_s4 = inlined_call_operand.vmem [shape: f32[1,32], index: 4, kind: input, shape index: {}]   ;;  %s833_s5 = inlined_call_operand.hbm [shape: f32[16,32], index: 5, kind: input, shape index: {}]   ;;  %s834_s6 = inlined_call_operand.vmem [shape: f32[1,32], index: 6, kind: input, shape index: {}]   ;;  %s835_s7 = inlined_call_operand.hbm [shape: f32[24,32], index: 7, kind: input, shape index: {}]   ;;  %s836_s8 = inlined_call_operand.vmem [shape: f32[1,32], index: 8, kind: input, shape index: {}]   ;;  %s837_s9 = inlined_call_operand.hbm [shape: f32[2,256], index: 9, kind: output, shape index: {}]  }
   0x1   :  { %15 = vsyncpa [#allocation6], 0 }
   0x2   :  { %16 = vsyncpa [#allocation9], 0 }
   0x3   :  { %17 = vsyncpa [#allocation12], 0 }
   0x4   :  { %18 = vsyncpa [#allocation4], 0  ;;  %s36_s11 = sshll.u32 %s829_s1, 4  ;;  %s692_s12 = smov [#allocation5]   ;;  %s37_s11 = int_to_ptr.hbm [resolvable:$true] %s36_s11 }
   0x5   :  { %s38_s13 = sshll.u32 %s692_s12, 4  ;;  %s62_s16 = sshll.u32 %s831_s3, 4  ;;  %s39_s13 = int_to_ptr.vmem [resolvable:$true] %s38_s13  ;;  %s63_s16 = int_to_ptr.hbm [resolvable:$true] %s62_s16 }
   0x6   :  { %s693_s17 = smov 128   ;;  %s694_s18 = smov 8  }
   0x7   :  { %44 = dma.hbm_to_vmem [thread:$0]  %s37_s11, 256, %s39_s13, [#allocation6], %s693_s17, %s693_s17, %s694_s18  }
   0x8   :  { %s695_s19 = smov [#allocation8]   ;;  %s23_s1 = sshll.u32 %s828_s0, 4  ;;  %s24_s1 = int_to_ptr.hbm [resolvable:$true] %s23_s1 }
   0x9   :  { %s64_s20 = sshll.u32 %s695_s19, 4  ;;  %s49_s24 = sshll.u32 %s830_s2, 4  ;;  %s65_s20 = int_to_ptr.vmem [resolvable:$true] %s64_s20  ;;  %s50_s24 = int_to_ptr.hbm [resolvable:$true] %s49_s24 }
   0xa   :  { %70 = dma.hbm_to_vmem [thread:$0]  %s63_s16, 512, %s65_s20, [#allocation9], %s693_s17, %s693_s17, %s694_s18  }
   0xb   :  { %s696_s25 = smov [#allocation2]   ;;  %s697_s27 = smov [#allocation7]  }
   0xc   :  { %s25_s26 = sshll.u32 %s696_s25, 4  ;;  %s51_s0 = sshll.u32 %s697_s27, 4  ;;  %s26_s26 = int_to_ptr.vmem [resolvable:$true] %s25_s26  ;;  %s52_s0 = int_to_ptr.vmem [resolvable:$true] %s51_s0 }
   0xd   :  { %31 = dma.hbm_to_vmem [thread:$0]  %s24_s1, 256, %s26_s26, [#allocation3], %s693_s17, %s693_s17, %s694_s18  }
   0xe   :  { %s77_s30 = sshll.u32 %s833_s5, 4  ;;  %s92_s11 = sshll.u32 %s835_s7, 4  ;;  %s78_s30 = int_to_ptr.hbm [resolvable:$true] %s77_s30  ;;  %s93_s11 = int_to_ptr.hbm [resolvable:$true] %s92_s11 }
   0xf   :  { %57 = dma.hbm_to_vmem [thread:$0]  %s50_s24, 256, %s52_s0, [#allocation6], %s693_s17, %s693_s17, %s694_s18  }
  0x10   :  { %s698_s12 = smov [#allocation10]   ;;  %s699_s14 = smov [#allocation11]  }
  0x11   :  { %s79_s13 = sshll.u32 %s698_s12, 4  ;;  %s94_s5 = sshll.u32 %s699_s14, 4  ;;  %s80_s13 = int_to_ptr.vmem [resolvable:$true] %s79_s13  ;;  %s95_s5 = int_to_ptr.vmem [resolvable:$true] %s94_s5 }
  0x12   :  { %85 = dma.hbm_to_vmem [thread:$0]  %s78_s30, 256, %s80_s13, [#allocation9], %s693_s17, %s693_s17, %s694_s18  }
  0x13   :  { %100 = dma.hbm_to_vmem [thread:$0]  %s93_s11, 384, %s95_s5, [#allocation12], %s693_s17, %s693_s17, %s694_s18  }
  0x14   :  { %682 = dma.done.wait [#allocation3], 256  }
  0x15   :  { %683 = vsyncadd [#allocation3], 4294967040 }
  0x16   :  { %684 = dma.done.wait [#allocation6], 512  }
  0x17   :  { %685 = vsyncadd [#allocation6], 4294966784 }
  0x18   :  { %686 = dma.done.wait [#allocation9], 768  }
  0x19   :  { %687 = vsyncadd [#allocation9], 4294966528 }
  0x1a   :  { %688 = dma.done.wait [#allocation12], 384  }
  0x1b   :  { %689 = vsyncadd [#allocation12], 4294966912  ;;  %v132_v0 = vld [vmem:[#allocation8 + $0x18] sm:$0xff]  ;;  %v170_v1 = vld [vmem:[#allocation10 + $0x8] sm:$0xff]  ;;  %vm175_vm0 = vcmask 130048   ;;  %vm137_vm1 = vcmask 261120  }
  0x1c   :  { %v131_v2 = vld [vmem:[#allocation8 + $0x10] sm:$0xff]  ;;  %156 = vmatpush.msra.mxu0 %v132_v0  ;;  %196 = vmatpush.msra.mxu1 %v170_v1  ;;  %v169_v3 = vld [vmem:[#allocation10] sm:$0xff]  ;;  %v130_v5 = vld [vmem:[#allocation8 + $0x8] sm:$0xff]  ;;  %vm214_vm2 = vcmask 195584   ;;  %vm296_vm3 = vcmask 64512   ;;  %vm366_vm4 = vcmask 1047556  }
  0x1d   :  { %v167_v4 = vld [vmem:[#allocation5] sm:$0xff]  ;;  %v127_v7 = vld [vmem:[#allocation2] sm:$0xff]  ;;  %v168_v8 = vld [vmem:[#allocation5 + $0x8] sm:$0xff]  ;;  %v700_v50 = vmov 1983009808   ;;  %s703_s18 = smov 64  }
  0x1e   :  { %157 = vmatpush.msra.mxu0 %v131_v2  ;;  %197 = vmatpush.msra.mxu1 %v169_v3  ;;  %v129_v6 = vld [vmem:[#allocation8] sm:$0xff]  ;;  %v128_v9 = vld [vmem:[#allocation2 + $0x8] sm:$0xff]  ;;  %v503_v10 = vld [vmem:[%s834_s6] ss:$0 sm:$0xff]  ;;  %v369_v51 = vunpack.c.l.s4 %v700_v50  ;;  %v701_v53 = vmov 1934713408  }
  0x1f   :  { %479 = vmatmul.msk.f32.vlgmr.msra.gmra.mxu1 %vm175_vm0, %v167_v4  ;;  %v504_v13 = vld [vmem:[%s832_s4] ss:$0 sm:$0xff]  ;;  %v209_v20 = vld [vmem:[#allocation11 + $0x10] sm:$0xff]  ;;  %v208_v21 = vld [vmem:[#allocation11 + $0x8] sm:$0xff]  ;;  %v391_v54 = vunpack.c.l.s4 %v701_v53  ;;  %s704_s19 = smov 96   ;;  %vm443_vm5 = vcmask 523264  }
  0x20   :  { %158 = vmatpush.msra.mxu0 %v130_v5  ;;  %234 = vmatpush.msra.mxu2 %v209_v20  ;;  %v207_v22 = vld [vmem:[#allocation11] sm:$0xff]  ;;  %v206_v28 = vld [vmem:[#allocation7 + $0x8] sm:$0xff]  ;;  %v370_v52 = vunpack.c.0.s8 %v369_v51  ;;  %vm445_vm6 = vcmask 785408   ;;  %s705_s20 = smov [#allocation13]   ;;  %s464_s3 = sshll.u32 %s837_s9, 4  ;;  %vm453_vm7 = vcmask 1041408   ;;  %s465_s3 = int_to_ptr.hbm [resolvable:$true] %s464_s3 }
  0x21   :  { %v205_v23 = vld [vmem:[#allocation7] sm:$0xff]  ;;  %v392_v59 = vunpack.c.0.s8 %v391_v54  ;;  %s462_s21 = sshll.u32 %s705_s20, 4  ;;  %s463_s21 = int_to_ptr.vmem [resolvable:$true] %s462_s21 }
  0x22   :  { %159 = vmatpush.msra.mxu0 %v129_v6  ;;  %235 = vmatpush.msra.mxu2 %v208_v21  ;;  %v505_v29 = vld [vmem:[%s836_s8] ss:$0 sm:$0xff]  ;;  %s702_s8 = smov 32  }
  0x23   :  { %477 = vmatmul.msk.f32.vlgmr.msra.gmra.mxu0 %vm137_vm1, %v127_v7 }
  0x24   :  { %236 = vmatpush.msra.mxu2 %v207_v22 }
  0x25   :  { %481 = vmatmul.msk.f32.vlgmr.msra.gmra.mxu2 %vm214_vm2, %v205_v23 }
  0x27   :  { %480 = vmatmul.msk.f32.gmra.mxu1 %vm175_vm0, %v168_v8 }
  0x2b   :  { %478 = vmatmul.msk.f32.gmra.mxu0 %vm137_vm1, %v128_v9 }
  0x2d   :  { %482 = vmatmul.msk.f32.gmra.mxu2 %vm214_vm2, %v206_v28 }
  0x9c   :  { %v199_v11 = vpop.f32.mrf.mxu1 }
  0x9d   :  { %v200_v12 = vadd.f32 %v503_v10, %v199_v11 }
  0x9f   :  { %483 = vmatpush.xpose.msk.msra.mxu3 %vm137_vm1, %v200_v12 }
  0xa0   :  { %v161_v14 = vpop.f32.mrf.mxu0 }
  0xa1   :  { %v162_v15 = vadd.f32 %v504_v13, %v161_v14 }
  0xa3   :  { %484 = vmatmul.msk.f32.vlgmr.msra.gmra.mxu3 %vm137_vm1, %v162_v15 }
  0xa4   :  { %v202_v16 = vpop.f32.mrf.mxu1 }
  0xa5   :  { %v203_v17 = vadd.f32 %v503_v10, %v202_v16 }
  0xa7   :  { %485 = vmatpush.xpose.msk.msrb.mxu3 %vm137_vm1, %v203_v17 }
  0xa8   :  { %v164_v18 = vpop.f32.mrf.mxu0  ;;  %v238_v30 = vpop.f32.mrf.mxu2 }
  0xa9   :  { %v165_v19 = vadd.f32 %v504_v13, %v164_v18  ;;  %v239_v31 = vadd.f32 %v505_v29, %v238_v30 }
  0xab   :  { %486 = vmatmul.msk.f32.vlgmr.msrb.gmra.mxu3 %vm137_vm1, %v165_v19  ;;  %337 = vmatpush.msrb.mxu1 %v239_v31 }
  0xb0   :  { %v241_v42 = vpop.f32.mrf.mxu2 }
  0xb1   :  { %v242_v43 = vadd.f32 %v505_v29, %v241_v42 }
  0xb3   :  { %360 = vmatpush.msra.mxu3 %v242_v43 }
 0x126   :  { %v267_v24 = vpop.f32.mrf.mxu3 }
 0x127   :  { %v297_v27 = vsel %vm296_vm3, %v267_v24, -inf }
 0x12e   :  { %v293_v25 = vpop.f32.mrf.mxu3 }
 0x12f   :  { %v300_v26 = vsel %vm296_vm3, %v293_v25, -inf }
 0x130   :  { %301 = vmax.xlane.f32.xlu0 %v300_v26 }
 0x138   :  { %298 = vmax.xlane.f32.xlu0 %v297_v27 }
 0x1a3   :  { %v302_v32 = vpop.xlane.xlu0 %301 }
 0x1a4   :  { %v304_v33 = vsub.f32 %v293_v25, %v302_v32 }
 0x1a6   :  { %v307_v34 = vmul.f32 1.442695, %v304_v33 }
 0x1a8   :  { %506 = vpow2.f32 %v307_v34 }
 0x1ab   :  { %v299_v35 = vpop.xlane.xlu0 %298 }
 0x1ac   :  { %v303_v36 = vsub.f32 %v267_v24, %v299_v35 }
 0x1ae   :  { %v507_v37 = vpop.eup %506  ;;  %v305_v38 = vmul.f32 1.442695, %v303_v36 }
 0x1af   :  { %v312_v39 = vsel %vm296_vm3, %v507_v37, 0.0 }
 0x1b0   :  { %508 = vpow2.f32 %v305_v38  ;;  %313 = vadd.xlane.f32.xlu1 %v312_v39 }
 0x1b6   :  { %v509_v40 = vpop.eup %508 }
 0x1b7   :  { %v309_v41 = vsel %vm296_vm3, %v509_v40, 0.0 }
 0x1b8   :  { %310 = vadd.xlane.f32.xlu1 %v309_v41 }
 0x223   :  { %v314_v44 = vpop.xlane.xlu1 %313 }
 0x224   :  { %510 = vrcp.f32 %v314_v44 }
 0x22a   :  { %v511_v45 = vpop.eup %510 }
 0x22b   :  { %v318_v46 = vmul.f32 %v511_v45, %v507_v37  ;;  %v311_v47 = vpop.xlane.xlu1 %310 }
 0x22c   :  { %512 = vrcp.f32 %v311_v47 }
 0x22d   :  { %488 = vmatmul.msk.f32.vlgmr.msra.gmra.mxu3 %vm296_vm3, %v318_v46 }
 0x232   :  { %v513_v48 = vpop.eup %512 }
 0x233   :  { %v317_v49 = vmul.f32 %v513_v48, %v509_v40 }
 0x235   :  { %487 = vmatmul.msk.f32.vlgmr.msrb.gmra.mxu1 %vm296_vm3, %v317_v49 }
 0x2b0   :  { %v362_v55 = vpop.f32.mrf.mxu3 }
 0x2b1   :  { %v376_v56 = vrot.slane %v362_v55, 4  ;;  %v381_v57 = vperm.slane %v362_v55, %v370_v52 }
 0x2b2   :  { %v339_v58 = vpop.f32.mrf.mxu1 }
 0x2b3   :  { %v386_v60 = vrot.slane %v381_v57, 4  ;;  %v365_v61 = vrot.slane %v339_v58, 4  ;;  %v371_v62 = vperm.slane %v339_v58, %v370_v52  ;;  %v377_v63 = vsel %vm366_vm4, 0.0, %v376_v56 }
 0x2b4   :  { %v385_v4 = vperm.slane %v377_v63, %v370_v52 }
 0x2b5   :  { %v367_v0 = vsel %vm366_vm4, 0.0, %v365_v61  ;;  %v387_v1 = vsel %vm366_vm4, %v386_v60, %v371_v62  ;;  %v388_v10 = vrot.slane %v371_v62, 4 }
 0x2b6   :  { %v375_v2 = vperm.slane %v367_v0, %v370_v52  ;;  %v393_v3 = vperm.slane %v387_v1, %v392_v59  ;;  %v398_v11 = vrot.slane %v385_v4, 4 }
 0x2b7   :  { %v389_v14 = vsel %vm366_vm4, %v381_v57, %v388_v10 }
 0x2b8   :  { %v400_v5 = vrot.slane %v375_v2, 4  ;;  %v410_v6 = vrot.slane %v393_v3, 4  ;;  %v399_v15 = vsel %vm366_vm4, %v398_v11, %v375_v2  ;;  %v397_v16 = vperm.slane %v389_v14, %v392_v59 }
 0x2b9   :  { %v405_v17 = vperm.slane %v399_v15, %v392_v59 }
 0x2ba   :  { %v411_v7 = vsel %vm366_vm4, 0.0, %v410_v6  ;;  %v401_v8 = vsel %vm366_vm4, %v385_v4, %v400_v5  ;;  %v412_v20 = vrot.slane %v397_v16, 4 }
 0x2bb   :  { %419 = vrot.lane.b32.xlu0 %v411_v7, %s702_s8  ;;  %v409_v9 = vperm.slane %v401_v8, %v392_v59  ;;  %v414_v18 = vrot.slane %v405_v17, 4 }
 0x2bc   :  { %v413_v21 = vsel %vm366_vm4, 0.0, %v412_v20 }
 0x2bd   :  { %435 = vrot.lane.b32.xlu2 %v409_v9, %s703_s18  ;;  %v416_v12 = vrot.slane %v409_v9, 4  ;;  %v415_v19 = vsel %vm366_vm4, 0.0, %v414_v18 }
 0x2bf   :  { %v417_v13 = vsel %vm366_vm4, 0.0, %v416_v12 }
 0x2c0   :  { %439 = vrot.lane.b32.xlu1 %v417_v13, %s704_s19 }
 0x2c5   :  { %423 = vrot.lane.b32.xlu2 %v397_v16, %s703_s18 }
 0x2cd   :  { %431 = vrot.lane.b32.xlu2 %v415_v19, %s702_s8 }
 0x2d5   :  { %427 = vrot.lane.b32.xlu2 %v413_v21, %s704_s19 }
 0x317   :  { %v436_v22 = vpop.permute.xlu2 %435 }
 0x31f   :  { %v424_v23 = vpop.permute.xlu2 %423 }
 0x327   :  { %v432_v24 = vpop.permute.xlu2 %431 }
 0x328   :  { %v447_v26 = vsel %vm137_vm1, %v405_v17, %v432_v24 }
 0x329   :  { %v448_v31 = vsel %vm443_vm5, %v447_v26, %v436_v22 }
 0x32d   :  { %v420_v25 = vpop.permute.xlu0 %419 }
 0x32e   :  { %v442_v27 = vsel %vm137_vm1, %v393_v3, %v420_v25 }
 0x32f   :  { %v444_v28 = vsel %vm443_vm5, %v442_v27, %v424_v23  ;;  %v428_v29 = vpop.permute.xlu2 %427 }
 0x330   :  { %v446_v34 = vsel %vm445_vm6, %v444_v28, %v428_v29 }
 0x332   :  { %v440_v30 = vpop.permute.xlu1 %439 }
 0x333   :  { %v449_v32 = vsel %vm445_vm6, %v448_v31, %v440_v30 }
 0x334   :  { %v452_v33 = vrot.slane %v449_v32, 6 }
 0x336   :  { %v454_v35 = vsel %vm453_vm7, %v446_v34, %v452_v33 }
 0x337   :  { %456 = vst [vmem:[#allocation13] sm:$0xf] %v454_v35 }
 0x338   :  { %467 = dma.vmem_to_hbm [thread:$0]  %s463_s21, 64, %s465_s3, [#allocation4]  }
 0x339   :  { %690 = dma.done.wait [#allocation4], 64  }
 0x33a   :  { %691 = vsyncadd [#allocation4], 4294967232 }
 0x33b   :  { %472 = vsyncpa [#allocation3], 1 }
 0x33c   :  { %473 = vsyncpa [#allocation6], 1 }
 0x33d   :  { %474 = vsyncpa [#allocation9], 1 }
 0x33e   :  { %475 = vsyncpa [#allocation12], 1 }
 0x33f   :  { %476 = vsyncpa [#allocation4], 1 }

</bundles_post_ra>
